<compile_context>
chip_gen: v6e
topology: v6e:2x2x1
jax: 0.10.0
libtpu: 0.0.40
codegen_flags: <defaults>
</compile_context>

<pallas_src>
import functools
import math

import jax
import jax.numpy as jnp
from jax.experimental import pallas as pl
from jax.experimental.pallas import tpu as pltpu

# ---------------- problem sizes (small, consistent with the module) ----------------
B = 2          # batch
N_Q = 8        # n_query
D_Q = 32       # n_query_channels (embed_dim)
N_KV = 16      # latent sequence length
D_KV = 48      # n_latent_channels (kdim / vdim)
NUM_HEADS = 1  # n_cross_att_heads (module default)
HEAD_DIM = D_Q // NUM_HEADS
LN_EPS = 1e-5


# ---------------------------------- Pallas kernel ----------------------------------
def decoder_kernel(query_ref, latent_ref, qlat_ref,
                   w_dq_ref, w_kv_ref, b_dq_ref, kvln_ref, b_kv_ref,
                   out_ref):
    # Single invocation: whole batch folded into the row (sublane) dimension.
    # b_dq rows: 0=qln_w 1=qln_b 2=bq(scaled) 3=bo 4=b1 5=b2
    # w_dq planes: 0=wq(scaled) 1=wo 2=w1 3=w2
    q_in = query_ref[...] + jnp.concatenate([qlat_ref[...]] * B, axis=0)   # (B*N_Q, D_Q)
    kv_in = latent_ref[...]                                                 # (B*N_KV, D_KV)

    def layernorm(x, w, b):
        mu = jnp.mean(x, axis=-1, keepdims=True)
        xc = x - mu
        var = jnp.mean(xc * xc, axis=-1, keepdims=True)
        return xc * jax.lax.rsqrt(var + LN_EPS) * w + b

    q = layernorm(q_in, b_dq_ref[0:1, :], b_dq_ref[1:2, :])                 # (B*N_Q, D_Q)
    kv = layernorm(kv_in, kvln_ref[0:1, :], kvln_ref[1:2, :])               # (B*N_KV, D_KV)

    # Q projection (1/sqrt(head_dim) softmax scale pre-folded into weight & bias).
    qp = jnp.dot(q, w_dq_ref[0], preferred_element_type=jnp.float32) + b_dq_ref[2:3, :]
    # Fused K/V projection: one (B*N_KV, D_KV) @ (D_KV, 2*D_Q) matmul.
    kvp = jnp.dot(kv, w_kv_ref[...], preferred_element_type=jnp.float32) + b_kv_ref[...]
    kp = kvp[:, :D_Q]
    vp = kvp[:, D_Q:]

    # Attention: tiny static unrolled loops over batch (B=2) and heads (1).
    batch_outs = []
    for b in range(B):
        qs_b = qp[b * N_Q:(b + 1) * N_Q, :]          # (N_Q, D_Q)
        ks_b = kp[b * N_KV:(b + 1) * N_KV, :]        # (N_KV, D_Q)
        vs_b = vp[b * N_KV:(b + 1) * N_KV, :]        # (N_KV, D_Q)
        head_outs = []
        for h in range(NUM_HEADS):
            sl = slice(h * HEAD_DIM, (h + 1) * HEAD_DIM)
            s = jnp.dot(qs_b[:, sl], ks_b[:, sl].T,
                        preferred_element_type=jnp.float32)                # (N_Q, N_KV)
            s = s - jnp.max(s, axis=-1, keepdims=True)
            p = jnp.exp(s)
            p = p * pl.reciprocal(jnp.sum(p, axis=-1, keepdims=True))
            head_outs.append(jnp.dot(p, vs_b[:, sl],
                                     preferred_element_type=jnp.float32))
        batch_outs.append(head_outs[0] if NUM_HEADS == 1
                          else jnp.concatenate(head_outs, axis=-1))
    attn = jnp.concatenate(batch_outs, axis=0)       # (B*N_Q, D_Q)

    # Output projection + residual onto the *normalized* q (matches PyTorch module).
    attn = jnp.dot(attn, w_dq_ref[1], preferred_element_type=jnp.float32) + b_dq_ref[3:4, :]
    # TODO(synk): dropout is identity at inference; not implemented as a stochastic op.
    x = q + attn

    # Positionwise feed-forward (exact erf-based GELU, like F.gelu default).
    h1 = jnp.dot(x, w_dq_ref[2], preferred_element_type=jnp.float32) + b_dq_ref[4:5, :]
    h1 = 0.5 * h1 * (1.0 + jax.lax.erf(h1 * (1.0 / math.sqrt(2.0))))
    h2 = jnp.dot(h1, w_dq_ref[3], preferred_element_type=jnp.float32) + b_dq_ref[5:6, :]
    out_ref[...] = h2 + x


# ------------------------------- parameter packing ---------------------------------
def pack_params(params):
    """One-time fold/stack of the 17 raw params into 6 kernel operands."""
    (qlat, qln_w, qln_b, kvln_w, kvln_b,
     wq_t, bq, wk_t, bk, wv_t, bv, wo_t, bo, w1_t, b1, w2_t, b2) = params
    scale = 1.0 / math.sqrt(HEAD_DIM)
    w_dq = jnp.stack([wq_t * scale, wo_t, w1_t, w2_t], axis=0)         # (4, D_Q, D_Q)
    w_kv = jnp.concatenate([wk_t, wv_t], axis=1)                       # (D_KV, 2*D_Q)
    b_dq = jnp.stack([qln_w, qln_b, bq * scale, bo, b1, b2], axis=0)   # (6, D_Q)
    kvln = jnp.stack([kvln_w, kvln_b], axis=0)                         # (2, D_KV)
    b_kv = jnp.concatenate([bk, bv], axis=0)[None, :]                  # (1, 2*D_Q)
    return (qlat, w_dq, w_kv, b_dq, kvln, b_kv)


# ------------------------------------ wrapper ---------------------------------------
@jax.jit
def transformer_decoder(query, latent, packed):
    """query: (B, N_Q, D_Q), latent: (B, N_KV, D_KV) -> (B, N_Q, D_Q)."""
    qlat, w_dq, w_kv, b_dq, kvln, b_kv = packed
    q2 = query.reshape(B * N_Q, D_Q)        # batch folded into rows
    l2 = latent.reshape(B * N_KV, D_KV)

    vmem_spec = functools.partial(pl.BlockSpec, memory_space=pltpu.MemorySpace.VMEM)
    out = pl.pallas_call(
        decoder_kernel,
        out_shape=jax.ShapeDtypeStruct((B * N_Q, D_Q), jnp.float32),
        in_specs=[vmem_spec() for _ in range(8)],
        out_specs=vmem_spec(),
    )(q2, l2, qlat, w_dq, w_kv, b_dq, kvln, b_kv)
    return out.reshape(B, N_Q, D_Q)


# ------------------------------- pure-JAX reference --------------------------------
def reference(query, latent, params):
    (qlat, qln_w, qln_b, kvln_w, kvln_b,
     wq_t, bq, wk_t, bk, wv_t, bv, wo_t, bo, w1_t, b1, w2_t, b2) = params

    def layernorm(x, w, b):
        mu = jnp.mean(x, axis=-1, keepdims=True)
        var = jnp.mean((x - mu) ** 2, axis=-1, keepdims=True)
        return (x - mu) / jnp.sqrt(var + LN_EPS) * w + b

    q = layernorm(query + qlat[None], qln_w, qln_b)            # (B, N_Q, D_Q)
    kv = layernorm(latent, kvln_w, kvln_b)                     # (B, N_KV, D_KV)

    qp = q @ wq_t + bq
    kp = kv @ wk_t + bk
    vp = kv @ wv_t + bv

    qh = qp.reshape(B, N_Q, NUM_HEADS, HEAD_DIM).transpose(0, 2, 1, 3)
    kh = kp.reshape(B, N_KV, NUM_HEADS, HEAD_DIM).transpose(0, 2, 1, 3)
    vh = vp.reshape(B, N_KV, NUM_HEADS, HEAD_DIM).transpose(0, 2, 1, 3)

    s = jnp.einsum("bhqd,bhkd->bhqk", qh, kh) / math.sqrt(HEAD_DIM)
    p = jax.nn.softmax(s, axis=-1)
    o = jnp.einsum("bhqk,bhkd->bhqd", p, vh)
    o = o.transpose(0, 2, 1, 3).reshape(B, N_Q, D_Q)
    attn = o @ wo_t + bo

    x = q + attn
    h1 = jax.nn.gelu(x @ w1_t + b1, approximate=False)
    return x + (h1 @ w2_t + b2)


# -------------------------------------- main ---------------------------------------
if __name__ == "__main__":
    key = jax.random.PRNGKey(0)
    ks = jax.random.split(key, 12)

    # nn.Parameter query_latent: normal(0, 0.02) clamped to [-2, 2]
    qlat = jnp.clip(0.02 * jax.random.normal(ks[0], (N_Q, D_Q)), -2.0, 2.0)

    # LayerNorm affine params (PyTorch default init: ones / zeros)
    qln_w = jnp.ones((D_Q,), jnp.float32)
    qln_b = jnp.zeros((D_Q,), jnp.float32)
    kvln_w = jnp.ones((D_KV,), jnp.float32)
    kvln_b = jnp.zeros((D_KV,), jnp.float32)

    def init_w(k, shape, fan_in):
        return (jax.random.normal(k, shape) / math.sqrt(fan_in)).astype(jnp.float32)

    # nn.MultiheadAttention with kdim/vdim != embed_dim -> separate q/k/v proj weights.
    # Pre-transposed to [in, out] for the kernel.
    wq_t = init_w(ks[1], (D_Q, D_Q), D_Q)
    wk_t = init_w(ks[2], (D_KV, D_Q), D_KV)
    wv_t = init_w(ks[3], (D_KV, D_Q), D_KV)
    bq = 0.01 * jax.random.normal(ks[4], (D_Q,)).astype(jnp.float32)
    bk = 0.01 * jax.random.normal(ks[5], (D_Q,)).astype(jnp.float32)
    bv = 0.01 * jax.random.normal(ks[6], (D_Q,)).astype(jnp.float32)
    wo_t = init_w(ks[7], (D_Q, D_Q), D_Q)
    bo = jnp.zeros((D_Q,), jnp.float32)

    # PositionwiseFeedForward(d_q, d_q)
    w1_t = init_w(ks[8], (D_Q, D_Q), D_Q)
    b1 = 0.01 * jax.random.normal(ks[9], (D_Q,)).astype(jnp.float32)
    w2_t = init_w(ks[10], (D_Q, D_Q), D_Q)
    b2 = jnp.zeros((D_Q,), jnp.float32)

    params = (qlat, qln_w, qln_b, kvln_w, kvln_b,
              wq_t, bq, wk_t, bk, wv_t, bv, wo_t, bo, w1_t, b1, w2_t, b2)
    packed = pack_params(params)

    xkey, lkey = jax.random.split(jax.random.PRNGKey(42))
    query = jax.random.normal(xkey, (B, N_Q, D_Q), jnp.float32)
    latent = jax.random.normal(lkey, (B, N_KV, D_KV), jnp.float32)

    out = transformer_decoder(query, latent, packed)
    out = jax.block_until_ready(out)

    ref = reference(query, latent, params)
    assert out.shape == (B, N_Q, D_Q)
    assert jnp.allclose(out, ref, rtol=1e-5, atol=1e-5), (
        f"max abs err = {jnp.max(jnp.abs(out - ref))}")

    print("KERNEL_OK")
</pallas_src>

<mosaic_0001>
module attributes {stable_mosaic.version = 11 : i64} {
  func.func @decoder_kernel(%arg0: memref<16x32xf32, #tpu.memory_space<vmem>>, %arg1: memref<32x48xf32, #tpu.memory_space<vmem>>, %arg2: memref<8x32xf32, #tpu.memory_space<vmem>>, %arg3: memref<4x32x32xf32, #tpu.memory_space<vmem>>, %arg4: memref<48x64xf32, #tpu.memory_space<vmem>>, %arg5: memref<6x32xf32, #tpu.memory_space<vmem>>, %arg6: memref<2x48xf32, #tpu.memory_space<vmem>>, %arg7: memref<1x64xf32, #tpu.memory_space<vmem>>, %arg8: memref<16x32xf32, #tpu.memory_space<vmem>>) attributes {dimension_semantics = [], scalar_prefetch = 0 : i64, scratch_operands = 0 : i64, tpu.core_type = #tpu.core_type<tc>} {
    %c0 = arith.constant 0 : index
    %c0_0 = arith.constant 0 : index
    %0 = vector.load %arg0[%c0, %c0_0] : memref<16x32xf32, #tpu.memory_space<vmem>>, vector<16x32xf32>
    %c0_1 = arith.constant 0 : index
    %c0_2 = arith.constant 0 : index
    %1 = vector.load %arg2[%c0_1, %c0_2] : memref<8x32xf32, #tpu.memory_space<vmem>>, vector<8x32xf32>
    %2 = tpu.concatenate %1, %1 in 0 : vector<8x32xf32>, vector<8x32xf32> -> vector<16x32xf32>
    %3 = arith.addf %0, %2 : vector<16x32xf32>
    %c0_3 = arith.constant 0 : index
    %c0_4 = arith.constant 0 : index
    %4 = vector.load %arg1[%c0_3, %c0_4] : memref<32x48xf32, #tpu.memory_space<vmem>>, vector<32x48xf32>
    %c0_5 = arith.constant 0 : index
    %c0_6 = arith.constant 0 : index
    %5 = vector.load %arg5[%c0_5, %c0_6] : memref<6x32xf32, #tpu.memory_space<vmem>>, vector<1x32xf32>
    %c1 = arith.constant 1 : index
    %c0_7 = arith.constant 0 : index
    %6 = vector.load %arg5[%c1, %c0_7] : memref<6x32xf32, #tpu.memory_space<vmem>>, vector<1x32xf32>
    %cst = arith.constant dense<0.000000e+00> : vector<16xf32>
    %7 = vector.multi_reduction <add>, %3, %cst [1] : vector<16x32xf32> to vector<16xf32>
    %8 = vector.shape_cast %7 : vector<16xf32> to vector<16x1xf32>
    %cst_8 = arith.constant 3.200000e+01 : f32
    %9 = vector.broadcast %cst_8 : f32 to vector<16x1xf32>
    %10 = arith.divf %8, %9 : vector<16x1xf32>
    %11 = vector.broadcast %10 : vector<16x1xf32> to vector<16x32xf32>
    %12 = arith.subf %3, %11 : vector<16x32xf32>
    %13 = arith.mulf %12, %12 : vector<16x32xf32>
    %cst_9 = arith.constant dense<0.000000e+00> : vector<16xf32>
    %14 = vector.multi_reduction <add>, %13, %cst_9 [1] : vector<16x32xf32> to vector<16xf32>
    %15 = vector.shape_cast %14 : vector<16xf32> to vector<16x1xf32>
    %cst_10 = arith.constant 3.200000e+01 : f32
    %16 = vector.broadcast %cst_10 : f32 to vector<16x1xf32>
    %17 = arith.divf %15, %16 : vector<16x1xf32>
    %cst_11 = arith.constant 9.99999974E-6 : f32
    %18 = vector.broadcast %cst_11 : f32 to vector<16x1xf32>
    %19 = arith.addf %17, %18 : vector<16x1xf32>
    %20 = math.rsqrt %19 : vector<16x1xf32>
    %21 = vector.broadcast %20 : vector<16x1xf32> to vector<16x32xf32>
    %22 = arith.mulf %12, %21 : vector<16x32xf32>
    %23 = vector.broadcast %5 : vector<1x32xf32> to vector<16x32xf32>
    %24 = arith.mulf %22, %23 : vector<16x32xf32>
    %25 = vector.broadcast %6 : vector<1x32xf32> to vector<16x32xf32>
    %26 = arith.addf %24, %25 : vector<16x32xf32>
    %c0_12 = arith.constant 0 : index
    %c0_13 = arith.constant 0 : index
    %27 = vector.load %arg6[%c0_12, %c0_13] : memref<2x48xf32, #tpu.memory_space<vmem>>, vector<1x48xf32>
    %c1_14 = arith.constant 1 : index
    %c0_15 = arith.constant 0 : index
    %28 = vector.load %arg6[%c1_14, %c0_15] : memref<2x48xf32, #tpu.memory_space<vmem>>, vector<1x48xf32>
    %cst_16 = arith.constant dense<0.000000e+00> : vector<32xf32>
    %29 = vector.multi_reduction <add>, %4, %cst_16 [1] : vector<32x48xf32> to vector<32xf32>
    %30 = vector.shape_cast %29 : vector<32xf32> to vector<32x1xf32>
    %cst_17 = arith.constant 4.800000e+01 : f32
    %31 = vector.broadcast %cst_17 : f32 to vector<32x1xf32>
    %32 = arith.divf %30, %31 : vector<32x1xf32>
    %33 = vector.broadcast %32 : vector<32x1xf32> to vector<32x48xf32>
    %34 = arith.subf %4, %33 : vector<32x48xf32>
    %35 = arith.mulf %34, %34 : vector<32x48xf32>
    %cst_18 = arith.constant dense<0.000000e+00> : vector<32xf32>
    %36 = vector.multi_reduction <add>, %35, %cst_18 [1] : vector<32x48xf32> to vector<32xf32>
    %37 = vector.shape_cast %36 : vector<32xf32> to vector<32x1xf32>
    %cst_19 = arith.constant 4.800000e+01 : f32
    %38 = vector.broadcast %cst_19 : f32 to vector<32x1xf32>
    %39 = arith.divf %37, %38 : vector<32x1xf32>
    %cst_20 = arith.constant 9.99999974E-6 : f32
    %40 = vector.broadcast %cst_20 : f32 to vector<32x1xf32>
    %41 = arith.addf %39, %40 : vector<32x1xf32>
    %42 = math.rsqrt %41 : vector<32x1xf32>
    %43 = vector.broadcast %42 : vector<32x1xf32> to vector<32x48xf32>
    %44 = arith.mulf %34, %43 : vector<32x48xf32>
    %45 = vector.broadcast %27 : vector<1x48xf32> to vector<32x48xf32>
    %46 = arith.mulf %44, %45 : vector<32x48xf32>
    %47 = vector.broadcast %28 : vector<1x48xf32> to vector<32x48xf32>
    %48 = arith.addf %46, %47 : vector<32x48xf32>
    %c0_21 = arith.constant 0 : index
    %c0_22 = arith.constant 0 : index
    %c0_23 = arith.constant 0 : index
    %49 = vector.load %arg3[%c0_21, %c0_22, %c0_23] : memref<4x32x32xf32, #tpu.memory_space<vmem>>, vector<1x32x32xf32>
    %50 = vector.shape_cast %49 : vector<1x32x32xf32> to vector<32x32xf32>
    %cst_24 = arith.constant dense<0.000000e+00> : vector<16x32xf32>
    %51 = tpu.matmul %26, %50, %cst_24 {dimension_numbers = #tpu.dot_dimension_numbers<[1], [0], [0], [1], [0, 0, 1, 1], [], []>} : vector<16x32xf32>, vector<32x32xf32>, vector<16x32xf32> -> vector<16x32xf32>
    %c2 = arith.constant 2 : index
    %c0_25 = arith.constant 0 : index
    %52 = vector.load %arg5[%c2, %c0_25] : memref<6x32xf32, #tpu.memory_space<vmem>>, vector<1x32xf32>
    %53 = vector.broadcast %52 : vector<1x32xf32> to vector<16x32xf32>
    %54 = arith.addf %51, %53 : vector<16x32xf32>
    %c0_26 = arith.constant 0 : index
    %c0_27 = arith.constant 0 : index
    %55 = vector.load %arg4[%c0_26, %c0_27] : memref<48x64xf32, #tpu.memory_space<vmem>>, vector<48x64xf32>
    %cst_28 = arith.constant dense<0.000000e+00> : vector<32x64xf32>
    %56 = tpu.matmul %48, %55, %cst_28 {dimension_numbers = #tpu.dot_dimension_numbers<[1], [0], [0], [1], [0, 0, 1, 1], [], []>} : vector<32x48xf32>, vector<48x64xf32>, vector<32x64xf32> -> vector<32x64xf32>
    %c0_29 = arith.constant 0 : index
    %c0_30 = arith.constant 0 : index
    %57 = vector.load %arg7[%c0_29, %c0_30] : memref<1x64xf32, #tpu.memory_space<vmem>>, vector<1x64xf32>
    %58 = vector.broadcast %57 : vector<1x64xf32> to vector<32x64xf32>
    %59 = arith.addf %56, %58 : vector<32x64xf32>
    %60 = vector.extract_strided_slice %59 {offsets = [0, 0], sizes = [32, 32], strides = [1, 1]} : vector<32x64xf32> to vector<32x32xf32>
    %61 = vector.extract_strided_slice %59 {offsets = [0, 32], sizes = [32, 32], strides = [1, 1]} : vector<32x64xf32> to vector<32x32xf32>
    %62 = vector.extract_strided_slice %54 {offsets = [0, 0], sizes = [8, 32], strides = [1, 1]} : vector<16x32xf32> to vector<8x32xf32>
    %63 = vector.extract_strided_slice %60 {offsets = [0, 0], sizes = [16, 32], strides = [1, 1]} : vector<32x32xf32> to vector<16x32xf32>
    %64 = vector.extract_strided_slice %61 {offsets = [0, 0], sizes = [16, 32], strides = [1, 1]} : vector<32x32xf32> to vector<16x32xf32>
    %65 = tpu.transpose %63, [1, 0] : vector<16x32xf32> -> vector<32x16xf32>
    %cst_31 = arith.constant dense<0.000000e+00> : vector<8x16xf32>
    %66 = tpu.matmul %62, %65, %cst_31 {dimension_numbers = #tpu.dot_dimension_numbers<[1], [0], [0], [1], [0, 0, 1, 1], [], []>} : vector<8x32xf32>, vector<32x16xf32>, vector<8x16xf32> -> vector<8x16xf32>
    %cst_32 = arith.constant dense<0xFF800000> : vector<8xf32>
    %67 = vector.multi_reduction <maximumf>, %66, %cst_32 [1] : vector<8x16xf32> to vector<8xf32>
    %68 = vector.shape_cast %67 : vector<8xf32> to vector<8x1xf32>
    %69 = vector.broadcast %68 : vector<8x1xf32> to vector<8x16xf32>
    %70 = arith.subf %66, %69 : vector<8x16xf32>
    %71 = math.exp %70 : vector<8x16xf32>
    %cst_33 = arith.constant dense<0.000000e+00> : vector<8xf32>
    %72 = vector.multi_reduction <add>, %71, %cst_33 [1] : vector<8x16xf32> to vector<8xf32>
    %73 = vector.shape_cast %72 : vector<8xf32> to vector<8x1xf32>
    %74 = tpu.reciprocal %73 : vector<8x1xf32> -> vector<8x1xf32>
    %75 = vector.broadcast %74 : vector<8x1xf32> to vector<8x16xf32>
    %76 = arith.mulf %71, %75 : vector<8x16xf32>
    %cst_34 = arith.constant dense<0.000000e+00> : vector<8x32xf32>
    %77 = tpu.matmul %76, %64, %cst_34 {dimension_numbers = #tpu.dot_dimension_numbers<[1], [0], [0], [1], [0, 0, 1, 1], [], []>} : vector<8x16xf32>, vector<16x32xf32>, vector<8x32xf32> -> vector<8x32xf32>
    %78 = vector.extract_strided_slice %54 {offsets = [8, 0], sizes = [8, 32], strides = [1, 1]} : vector<16x32xf32> to vector<8x32xf32>
    %79 = vector.extract_strided_slice %60 {offsets = [16, 0], sizes = [16, 32], strides = [1, 1]} : vector<32x32xf32> to vector<16x32xf32>
    %80 = vector.extract_strided_slice %61 {offsets = [16, 0], sizes = [16, 32], strides = [1, 1]} : vector<32x32xf32> to vector<16x32xf32>
    %81 = tpu.transpose %79, [1, 0] : vector<16x32xf32> -> vector<32x16xf32>
    %cst_35 = arith.constant dense<0.000000e+00> : vector<8x16xf32>
    %82 = tpu.matmul %78, %81, %cst_35 {dimension_numbers = #tpu.dot_dimension_numbers<[1], [0], [0], [1], [0, 0, 1, 1], [], []>} : vector<8x32xf32>, vector<32x16xf32>, vector<8x16xf32> -> vector<8x16xf32>
    %cst_36 = arith.constant dense<0xFF800000> : vector<8xf32>
    %83 = vector.multi_reduction <maximumf>, %82, %cst_36 [1] : vector<8x16xf32> to vector<8xf32>
    %84 = vector.shape_cast %83 : vector<8xf32> to vector<8x1xf32>
    %85 = vector.broadcast %84 : vector<8x1xf32> to vector<8x16xf32>
    %86 = arith.subf %82, %85 : vector<8x16xf32>
    %87 = math.exp %86 : vector<8x16xf32>
    %cst_37 = arith.constant dense<0.000000e+00> : vector<8xf32>
    %88 = vector.multi_reduction <add>, %87, %cst_37 [1] : vector<8x16xf32> to vector<8xf32>
    %89 = vector.shape_cast %88 : vector<8xf32> to vector<8x1xf32>
    %90 = tpu.reciprocal %89 : vector<8x1xf32> -> vector<8x1xf32>
    %91 = vector.broadcast %90 : vector<8x1xf32> to vector<8x16xf32>
    %92 = arith.mulf %87, %91 : vector<8x16xf32>
    %cst_38 = arith.constant dense<0.000000e+00> : vector<8x32xf32>
    %93 = tpu.matmul %92, %80, %cst_38 {dimension_numbers = #tpu.dot_dimension_numbers<[1], [0], [0], [1], [0, 0, 1, 1], [], []>} : vector<8x16xf32>, vector<16x32xf32>, vector<8x32xf32> -> vector<8x32xf32>
    %94 = tpu.concatenate %77, %93 in 0 : vector<8x32xf32>, vector<8x32xf32> -> vector<16x32xf32>
    %c1_39 = arith.constant 1 : index
    %c0_40 = arith.constant 0 : index
    %c0_41 = arith.constant 0 : index
    %95 = vector.load %arg3[%c1_39, %c0_40, %c0_41] : memref<4x32x32xf32, #tpu.memory_space<vmem>>, vector<1x32x32xf32>
    %96 = vector.shape_cast %95 : vector<1x32x32xf32> to vector<32x32xf32>
    %cst_42 = arith.constant dense<0.000000e+00> : vector<16x32xf32>
    %97 = tpu.matmul %94, %96, %cst_42 {dimension_numbers = #tpu.dot_dimension_numbers<[1], [0], [0], [1], [0, 0, 1, 1], [], []>} : vector<16x32xf32>, vector<32x32xf32>, vector<16x32xf32> -> vector<16x32xf32>
    %c3 = arith.constant 3 : index
    %c0_43 = arith.constant 0 : index
    %98 = vector.load %arg5[%c3, %c0_43] : memref<6x32xf32, #tpu.memory_space<vmem>>, vector<1x32xf32>
    %99 = vector.broadcast %98 : vector<1x32xf32> to vector<16x32xf32>
    %100 = arith.addf %97, %99 : vector<16x32xf32>
    %101 = arith.addf %26, %100 : vector<16x32xf32>
    %c2_44 = arith.constant 2 : index
    %c0_45 = arith.constant 0 : index
    %c0_46 = arith.constant 0 : index
    %102 = vector.load %arg3[%c2_44, %c0_45, %c0_46] : memref<4x32x32xf32, #tpu.memory_space<vmem>>, vector<1x32x32xf32>
    %103 = vector.shape_cast %102 : vector<1x32x32xf32> to vector<32x32xf32>
    %cst_47 = arith.constant dense<0.000000e+00> : vector<16x32xf32>
    %104 = tpu.matmul %101, %103, %cst_47 {dimension_numbers = #tpu.dot_dimension_numbers<[1], [0], [0], [1], [0, 0, 1, 1], [], []>} : vector<16x32xf32>, vector<32x32xf32>, vector<16x32xf32> -> vector<16x32xf32>
    %c4 = arith.constant 4 : index
    %c0_48 = arith.constant 0 : index
    %105 = vector.load %arg5[%c4, %c0_48] : memref<6x32xf32, #tpu.memory_space<vmem>>, vector<1x32xf32>
    %106 = vector.broadcast %105 : vector<1x32xf32> to vector<16x32xf32>
    %107 = arith.addf %104, %106 : vector<16x32xf32>
    %cst_49 = arith.constant 5.000000e-01 : f32
    %108 = vector.broadcast %cst_49 : f32 to vector<16x32xf32>
    %109 = arith.mulf %108, %107 : vector<16x32xf32>
    %cst_50 = arith.constant 0.707106769 : f32
    %110 = vector.broadcast %cst_50 : f32 to vector<16x32xf32>
    %111 = arith.mulf %107, %110 : vector<16x32xf32>
    %112 = math.erf %111 : vector<16x32xf32>
    %cst_51 = arith.constant 1.000000e+00 : f32
    %113 = vector.broadcast %cst_51 : f32 to vector<16x32xf32>
    %114 = arith.addf %113, %112 : vector<16x32xf32>
    %115 = arith.mulf %109, %114 : vector<16x32xf32>
    %c3_52 = arith.constant 3 : index
    %c0_53 = arith.constant 0 : index
    %c0_54 = arith.constant 0 : index
    %116 = vector.load %arg3[%c3_52, %c0_53, %c0_54] : memref<4x32x32xf32, #tpu.memory_space<vmem>>, vector<1x32x32xf32>
    %117 = vector.shape_cast %116 : vector<1x32x32xf32> to vector<32x32xf32>
    %cst_55 = arith.constant dense<0.000000e+00> : vector<16x32xf32>
    %118 = tpu.matmul %115, %117, %cst_55 {dimension_numbers = #tpu.dot_dimension_numbers<[1], [0], [0], [1], [0, 0, 1, 1], [], []>} : vector<16x32xf32>, vector<32x32xf32>, vector<16x32xf32> -> vector<16x32xf32>
    %c5 = arith.constant 5 : index
    %c0_56 = arith.constant 0 : index
    %119 = vector.load %arg5[%c5, %c0_56] : memref<6x32xf32, #tpu.memory_space<vmem>>, vector<1x32xf32>
    %120 = vector.broadcast %119 : vector<1x32xf32> to vector<16x32xf32>
    %121 = arith.addf %118, %120 : vector<16x32xf32>
    %122 = arith.addf %121, %101 : vector<16x32xf32>
    %c0_57 = arith.constant 0 : index
    %c0_58 = arith.constant 0 : index
    %123 = vector.load %arg8[%c0_57, %c0_58] : memref<16x32xf32, #tpu.memory_space<vmem>>, vector<16x32xf32>
    tpu.vector_store %arg8[%c0_57, %c0_58], %122 {strides = array<i32>} : memref<16x32xf32, #tpu.memory_space<vmem>>, vector<16x32xf32>,
    return
  }
}

</mosaic_0001>

<bundles_post_ra>
// kernel: transformer_decoder.1
= control target key start
LH: loop header
LB: loop body
LE: loop exit
PB: predicated region body
PF: predicated region fallthrough
CT: control target
= control target key end

     0   :  { %13 = vsyncpa [#allocation3], 0  ;;  %s1602_s0 = inlined_call_operand.hbm [shape: f32[16,32], index: 0, kind: input, shape index: {}]   ;;  %s1603_s1 = inlined_call_operand.hbm [shape: f32[32,48], index: 1, kind: input, shape index: {}]   ;;  %s1604_s2 = inlined_call_operand.hbm [shape: f32[8,32], index: 2, kind: input, shape index: {}]   ;;  %s1605_s3 = inlined_call_operand.hbm [shape: f32[4,32,32], index: 3, kind: input, shape index: {}]   ;;  %s1606_s4 = inlined_call_operand.hbm [shape: f32[48,64], index: 4, kind: input, shape index: {}]   ;;  %s1607_s5 = inlined_call_operand.vmem [shape: f32[6,32], index: 5, kind: input, shape index: {}]   ;;  %s1608_s6 = inlined_call_operand.vmem [shape: f32[2,48], index: 6, kind: input, shape index: {}]   ;;  %s1609_s7 = inlined_call_operand.vmem [shape: f32[1,64], index: 7, kind: input, shape index: {}]   ;;  %s1610_s8 = inlined_call_operand.hbm [shape: f32[16,32], index: 8, kind: output, shape index: {}]  }
   0x1   :  { %14 = vsyncpa [#allocation6], 0 }
   0x2   :  { %15 = vsyncpa [#allocation9], 0 }
   0x3   :  { %16 = vsyncpa [#allocation4], 0  ;;  %s1394_s27 = smov [#allocation5]   ;;  %s1395_s29 = smov [#allocation8]  }
   0x4   :  { %s34_s28 = sshll.u32 %s1394_s27, 4  ;;  %s56_s30 = sshll.u32 %s1395_s29, 4  ;;  %s35_s28 = int_to_ptr.vmem [resolvable:$true] %s34_s28  ;;  %s57_s30 = int_to_ptr.vmem [resolvable:$true] %s56_s30 }
   0x5   :  { %s1274_s9 = scalar_lea.vmem %s35_s28, 512  ;;  %p1279_p1 = scmp.lt.s32.totalorder %s35_s28, %s35_s28 }
   0x6   :  { %p1275_p0 = scmp.ne.s32.totalorder %s35_s28, %s1274_s9  ;;  %p1280_p2 = scmp.lt.s32.totalorder %s1274_s9, %s1274_s9 }
   0x8   :  { %p1281_p3 = por %p1280_p2, %p1279_p1 }
   0xa   :  { %p1282_p4 = pnand %p1281_p3, %p1275_p0 }
   0xc   :  { %1285 = shalt.err (!%p1282_p4)
}
   0xd   :  { %s1396_s10 = smov 128   ;;  %s1397_s11 = smov 8  }
   0xe   :  { %40 = dma.hbm_to_vmem [thread:$0]  %s1603_s1, 512, %s35_s28, [#allocation6], %s1396_s10, %s1396_s10, %s1397_s11  }
   0xf   :  { %s1294_s14 = scalar_lea.vmem %s57_s30, 2048  ;;  %p1299_p6 = scmp.lt.s32.totalorder %s57_s30, %s57_s30 }
  0x10   :  { %p1295_p5 = scmp.ne.s32.totalorder %s57_s30, %s1294_s14  ;;  %p1300_p7 = scmp.lt.s32.totalorder %s1294_s14, %s1294_s14 }
  0x12   :  { %p1301_p8 = por %p1300_p7, %p1299_p6 }
  0x14   :  { %p1302_p9 = pnand %p1301_p8, %p1295_p5 }
  0x16   :  { %1305 = shalt.err (!%p1302_p9)
}
  0x17   :  { %62 = dma.hbm_to_vmem [thread:$0]  %s1605_s3, 2048, %s57_s30, [#allocation9], %s1396_s10, %s1396_s10, %s1397_s11  }
  0x18   :  { %s1398_s17 = smov [#allocation2]   ;;  %s1399_s19 = smov [#allocation7]  }
  0x19   :  { %s22_s18 = sshll.u32 %s1398_s17, 4  ;;  %s47_s20 = sshll.u32 %s1399_s19, 4  ;;  %s23_s18 = int_to_ptr.vmem [resolvable:$true] %s22_s18  ;;  %s48_s20 = int_to_ptr.vmem [resolvable:$true] %s47_s20 }
  0x1a   :  { %s1314_s1 = scalar_lea.vmem %s23_s18, 256  ;;  %p1319_p11 = scmp.lt.s32.totalorder %s23_s18, %s23_s18 }
  0x1b   :  { %p1315_p10 = scmp.ne.s32.totalorder %s23_s18, %s1314_s1  ;;  %p1320_p12 = scmp.lt.s32.totalorder %s1314_s1, %s1314_s1 }
  0x1d   :  { %p1321_p13 = por %p1320_p12, %p1319_p11 }
  0x1f   :  { %p1322_p0 = pnand %p1321_p13, %p1315_p10 }
  0x21   :  { %1325 = shalt.err (!%p1322_p0)
}
  0x22   :  { %28 = dma.hbm_to_vmem [thread:$0]  %s1602_s0, 256, %s23_s18, [#allocation3], %s1396_s10, %s1396_s10, %s1397_s11  }
  0x23   :  { %s1334_s3 = scalar_lea.vmem %s48_s20, 128  ;;  %p1339_p2 = scmp.lt.s32.totalorder %s48_s20, %s48_s20 }
  0x24   :  { %p1335_p1 = scmp.ne.s32.totalorder %s48_s20, %s1334_s3  ;;  %p1340_p3 = scmp.lt.s32.totalorder %s1334_s3, %s1334_s3 }
  0x26   :  { %p1341_p4 = por %p1340_p3, %p1339_p2 }
  0x28   :  { %p1342_p5 = pnand %p1341_p4, %p1335_p1 }
  0x2a   :  { %1345 = shalt.err (!%p1342_p5)
}
  0x2b   :  { %50 = dma.hbm_to_vmem [thread:$0]  %s1604_s2, 128, %s48_s20, [#allocation6]  }
  0x2c   :  { %s1400_s25 = smov [#allocation10]  }
  0x2d   :  { %s68_s26 = sshll.u32 %s1400_s25, 4  ;;  %s69_s26 = int_to_ptr.vmem [resolvable:$true] %s68_s26 }
  0x2e   :  { %s1354_s27 = scalar_lea.vmem %s69_s26, 768  ;;  %p1359_p7 = scmp.lt.s32.totalorder %s69_s26, %s69_s26 }
  0x2f   :  { %p1355_p6 = scmp.ne.s32.totalorder %s69_s26, %s1354_s27  ;;  %p1360_p8 = scmp.lt.s32.totalorder %s1354_s27, %s1354_s27 }
  0x31   :  { %p1361_p9 = por %p1360_p8, %p1359_p7 }
  0x33   :  { %p1362_p10 = pnand %p1361_p9, %p1355_p6 }
  0x35   :  { %1365 = shalt.err (!%p1362_p10)
}
  0x36   :  { %74 = dma.hbm_to_vmem [thread:$0]  %s1606_s4, 768, %s69_s26, [#allocation9], %s1396_s10, %s1396_s10, %s1397_s11  }
  0x37   :  { %1386 = dma.done.wait [#allocation3], 256  }
  0x38   :  { %1387 = vsyncadd [#allocation3], 4294967040 }
  0x39   :  { %1388 = dma.done.wait [#allocation6], 640  }
  0x3a   :  { %1389 = vsyncadd [#allocation6], 4294966656 }
  0x3b   :  { %1390 = dma.done.wait [#allocation9], 2816  }
  0x3c   :  { %1391 = vsyncadd [#allocation9], 4294964480  ;;  %vm149_vm0 = vcmask 392192   ;;  %v101_v0 = vld [vmem:[#allocation5] sm:$0xff]  ;;  %v103_v1 = vld [vmem:[#allocation5 + $0x10] sm:$0xff]  ;;  %vm107_vm1 = vcmask 261120  }
  0x3d   :  { %v102_v2 = vld [vmem:[#allocation5 + $0x8] sm:$0xff]  ;;  %v150_v3 = vsel %vm149_vm0, %v101_v0, 0.0  ;;  %v156_v4 = vsel %vm149_vm0, %v103_v1, 0.0  ;;  %v96_v5 = vld [vmem:[#allocation2] sm:$0xff]  ;;  %v98_v6 = vld [vmem:[#allocation7] sm:$0xff]  ;;  %vm1402_vm2 = vmmov 0  }
  0x3e   :  { %151 = vadd.xlane.f32.xlu0 %v150_v3  ;;  %157 = vadd.xlane.f32.xlu1 %v156_v4  ;;  %v99_v7 = vadd.f32 %v98_v6, %v96_v5  ;;  %v97_v8 = vld [vmem:[#allocation2 + $0x8] sm:$0xff]  ;;  %v153_v9 = vsel %vm149_vm0, %v102_v2, 0.0  ;;  %v314_v45 = vld [vmem:[#allocation10 + $0x28] sm:$0xff]  ;;  %v313_v46 = vld [vmem:[#allocation10 + $0x20] sm:$0xff]  ;;  %vm498_vm3 = vcmask 130048   ;;  %s1403_s17 = smov 96  }
  0x3f   :  { %v100_v10 = vadd.f32 %v98_v6, %v97_v8  ;;  %v104_v11 = vld [vmem:[#allocation5 + $0x18] sm:$0xff]  ;;  %1152 = vmatprep.subr.mxu1 %v314_v45  ;;  %v312_v47 = vld [vmem:[#allocation10 + $0x18] sm:$0xff]  ;;  %v310_v49 = vld [vmem:[#allocation10 + $0x8] sm:$0xff]  ;;  %s1404_s3 = smov [#allocation11]  }
  0x40   :  { %v108_v12 = vsel %vm107_vm1, %v99_v7, 0.0  ;;  %v159_v13 = vsel %vm149_vm0, %v104_v11, 0.0  ;;  %1153 = vmatpush3.msra.mxu1 %v314_v45  ;;  %v311_v48 = vld [vmem:[#allocation10 + $0x10] sm:$0xff]  ;;  %v309_v50 = vld [vmem:[#allocation10] sm:$0xff]  ;;  %v222_v51 = vld [vmem:[#allocation8 + $0x18] sm:$0xff]  ;;  %s1052_s23 = sshll.u32 %s1404_s3, 4  ;;  %s1053_s23 = int_to_ptr.vmem [resolvable:$true] %s1052_s23 }
  0x41   :  { %v111_v14 = vsel %vm107_vm1, %v100_v10, 0.0  ;;  %1154 = vmatprep.subr.mxu1 %v313_v46  ;;  %1141 = vmatprep.subr.mxu0 %v222_v51  ;;  %v221_v52 = vld [vmem:[#allocation8 + $0x10] sm:$0xff]  ;;  %v220_v53 = vld [vmem:[#allocation8 + $0x8] sm:$0xff]  ;;  %v219_v54 = vld [vmem:[#allocation8] sm:$0xff]  ;;  %s1366_s24 = scalar_lea.vmem %s1053_s23, 256  ;;  %p1371_p12 = scmp.lt.s32.totalorder %s1053_s23, %s1053_s23 }
  0x42   :  { %154 = vadd.xlane.f32.xlu0 %v153_v9  ;;  %109 = vadd.xlane.f32.xlu1 %v108_v12  ;;  %v1069_v12 = vld [vmem:[%s1608_s6 + $0x1] ss:$0 sm:$0xff]  ;;  %p1367_p11 = scmp.ne.s32.totalorder %s1053_s23, %s1366_s24  ;;  %p1372_p13 = scmp.lt.s32.totalorder %s1366_s24, %s1366_s24 }
  0x43   :  { %1155 = vmatpush3.msra.mxu1 %v313_v46  ;;  %1142 = vmatpush3.msra.mxu0 %v222_v51 }
  0x44   :  { %1156 = vmatprep.subr.mxu1 %v312_v47  ;;  %1143 = vmatprep.subr.mxu0 %v221_v52  ;;  %p1373_p0 = por %p1372_p13, %p1371_p12 }
  0x45   :  { %1157 = vmatpush3.msra.mxu1 %v312_v47  ;;  %1144 = vmatpush3.msra.mxu0 %v221_v52 }
  0x46   :  { %160 = vadd.xlane.f32.xlu0 %v159_v13  ;;  %112 = vadd.xlane.f32.xlu1 %v111_v14  ;;  %p1374_p1 = pnand %p1373_p0, %p1367_p11 }
  0x47   :  { %1158 = vmatprep.subr.mxu1 %v311_v48  ;;  %1145 = vmatprep.subr.mxu0 %v220_v53 }
  0x48   :  { %1159 = vmatpush3.msra.mxu1 %v311_v48  ;;  %1146 = vmatpush3.msra.mxu0 %v220_v53  ;;  %v1070_v48 = vld [vmem:[%s1607_s5 + $0x2] ss:$0 sm:$0xff] }
  0x49   :  { %1160 = vmatprep.subr.mxu1 %v310_v49  ;;  %1147 = vmatprep.subr.mxu0 %v219_v54 }
  0x4a   :  { %1161 = vmatpush3.msra.mxu1 %v310_v49  ;;  %1148 = vmatpush3.msra.mxu0 %v219_v54 }
  0x4b   :  { %1162 = vmatprep.subr.mxu1 %v309_v50 }
  0x4c   :  { %1163 = vmatpush3.msra.mxu1 %v309_v50 }
  0xc7   :  { %v152_v15 = vpop.xlane.xlu0 %151  ;;  %v158_v16 = vpop.xlane.xlu1 %157 }
  0xc8   :  { %v163_v17 = vmul.f32 0.020833334, %v152_v15  ;;  %v165_v18 = vmul.f32 0.020833334, %v158_v16 }
  0xca   :  { %v1483_v19 = vsub.f32 %v101_v0, %v163_v17  ;;  %v1485_v20 = vsub.f32 %v103_v1, %v165_v18 }
  0xcb   :  { %v155_v21 = vpop.xlane.xlu0 %154  ;;  %v110_v22 = vpop.xlane.xlu1 %109 }
  0xcc   :  { %v164_v23 = vmul.f32 0.020833334, %v155_v21  ;;  %v171_v24 = vmul.f32 %v1483_v19, %v1483_v19  ;;  %v115_v25 = vmul.f32 0.03125, %v110_v22  ;;  %v173_v26 = vmul.f32 %v1485_v20, %v1485_v20 }
  0xce   :  { %v1491_v27 = vsub.f32 %v102_v2, %v164_v23  ;;  %v175_v28 = vsel %vm149_vm0, %v171_v24, 0.0  ;;  %v1494_v29 = vsub.f32 %v99_v7, %v115_v25  ;;  %v181_v31 = vsel %vm149_vm0, %v173_v26, 0.0 }
  0xcf   :  { %176 = vadd.xlane.f32.xlu0 %v175_v28  ;;  %v161_v30 = vpop.xlane.xlu0 %160  ;;  %v113_v32 = vpop.xlane.xlu1 %112 }
  0xd0   :  { %v166_v33 = vmul.f32 0.020833334, %v161_v30  ;;  %v172_v34 = vmul.f32 %v1491_v27, %v1491_v27  ;;  %v116_v35 = vmul.f32 0.03125, %v113_v32  ;;  %v119_v36 = vmul.f32 %v1494_v29, %v1494_v29 }
  0xd2   :  { %v1501_v37 = vsub.f32 %v104_v11, %v166_v33  ;;  %v178_v38 = vsel %vm149_vm0, %v172_v34, 0.0  ;;  %v1504_v39 = vsub.f32 %v100_v10, %v116_v35  ;;  %v121_v41 = vsel %vm107_vm1, %v119_v36, 0.0  ;;  %v1068_v10 = vld [vmem:[%s1608_s6] ss:$0 sm:$0xff] }
  0xd3   :  { %182 = vadd.xlane.f32.xlu0 %v181_v31  ;;  %179 = vadd.xlane.f32.xlu1 %v178_v38  ;;  %v1073_v38 = vld [vmem:[%s1609_s7] ss:$0 sm:$0xff] }
  0xd4   :  { %v174_v40 = vmul.f32 %v1501_v37, %v1501_v37  ;;  %v120_v42 = vmul.f32 %v1504_v39, %v1504_v39 }
  0xd6   :  { %v184_v43 = vsel %vm149_vm0, %v174_v40, 0.0  ;;  %v124_v44 = vsel %vm107_vm1, %v120_v42, 0.0 }
  0xd7   :  { %185 = vadd.xlane.f32.xlu0 %v184_v43  ;;  %122 = vadd.xlane.f32.xlu1 %v121_v41 }
  0xdb   :  { %125 = vadd.xlane.f32.xlu1 %v124_v44 }
 0x158   :  { %v177_v55 = vpop.xlane.xlu0 %176 }
 0x159   :  { %v187_v56 = vmul.f32 0.020833334, %v177_v55 }
 0x15b   :  { %v191_v57 = vadd.f32 1e-05, %v187_v56 }
 0x15c   :  { %v183_v58 = vpop.xlane.xlu0 %182  ;;  %v180_v59 = vpop.xlane.xlu1 %179 }
 0x15d   :  { %1242 = vrsqrt.f32 %v191_v57  ;;  %v189_v60 = vmul.f32 0.020833334, %v183_v58  ;;  %v188_v61 = vmul.f32 0.020833334, %v180_v59 }
 0x15f   :  { %v193_v62 = vadd.f32 1e-05, %v189_v60  ;;  %v192_v63 = vadd.f32 1e-05, %v188_v61 }
 0x160   :  { %v186_v0 = vpop.xlane.xlu0 %185  ;;  %v123_v1 = vpop.xlane.xlu1 %122 }
 0x161   :  { %1244 = vrsqrt.f32 %v193_v62  ;;  %v190_v2 = vmul.f32 0.020833334, %v186_v0  ;;  %v127_v3 = vmul.f32 0.03125, %v123_v1 }
 0x162   :  { %1246 = vrsqrt.f32 %v192_v63 }
 0x163   :  { %v194_v4 = vadd.f32 1e-05, %v190_v2  ;;  %v129_v5 = vadd.f32 1e-05, %v127_v3 }
 0x164   :  { %v126_v6 = vpop.xlane.xlu1 %125 }
 0x165   :  { %1248 = vrsqrt.f32 %v194_v4  ;;  %v128_v7 = vmul.f32 0.03125, %v126_v6  ;;  %v762_v4 = vld [vmem:[#allocation8 + $0x38] sm:$0xff] }
 0x166   :  { %1250 = vrsqrt.f32 %v129_v5  ;;  %v761_v5 = vld [vmem:[#allocation8 + $0x30] sm:$0xff] }
 0x167   :  { %v130_v8 = vadd.f32 1e-05, %v128_v7 }
 0x169   :  { %1252 = vrsqrt.f32 %v130_v8 }
 0x16a   :  { %v1243_v9 = vpop.eup %1242 }
 0x16b   :  { %v199_v11 = vmul.f32 %v1243_v9, %v1483_v19  ;;  %v1066_v19 = vld [vmem:[%s1607_s5] ss:$0 sm:$0xff] }
 0x16d   :  { %v207_v13 = vmul.f32 %v1068_v10, %v199_v11 }
 0x16e   :  { %v1245_v14 = vpop.eup %1244 }
 0x16f   :  { %v1247_v15 = vpop.eup %1246  ;;  %v215_v16 = vadd.f32 %v1069_v12, %v207_v13  ;;  %v201_v17 = vmul.f32 %v1245_v14, %v1485_v20  ;;  %v1067_v20 = vld [vmem:[%s1607_s5 + $0x1] ss:$0 sm:$0xff] }
 0x170   :  { %v200_v18 = vmul.f32 %v1247_v15, %v1491_v27 }
 0x171   :  { %1164 = vmatprep.mubr.msk.f32.mxu1 %vm149_vm0, %v215_v16  ;;  %v209_v21 = vmul.f32 %v1068_v10, %v201_v17  ;;  %v760_v16 = vld [vmem:[#allocation8 + $0x28] sm:$0xff]  ;;  %v759_v17 = vld [vmem:[#allocation8 + $0x20] sm:$0xff] }
 0x172   :  { %v1249_v22 = vpop.eup %1248  ;;  %v208_v23 = vmul.f32 %v1068_v10, %v200_v18 }
 0x173   :  { %v1251_v24 = vpop.eup %1250  ;;  %v217_v25 = vadd.f32 %v1069_v12, %v209_v21  ;;  %v202_v26 = vmul.f32 %v1249_v22, %v1501_v37  ;;  %v1401_v37 = vmov 0.0  }
 0x174   :  { %v216_v28 = vadd.f32 %v1069_v12, %v208_v23  ;;  %v133_v30 = vmul.f32 %v1251_v24, %v1494_v29  ;;  %1170 = vmatprep.subr.mxu0 %v1401_v37  ;;  %1184 = vmatprep.subr.mxu1 %v1401_v37  ;;  %v855_v24 = vld [vmem:[#allocation8 + $0x58] sm:$0xff] }
 0x175   :  { %v210_v27 = vmul.f32 %v1068_v10, %v202_v26  ;;  %v852_v26 = vld [vmem:[#allocation8 + $0x40] sm:$0xff] }
 0x176   :  { %v1253_v31 = vpop.eup %1252  ;;  %1165 = vmatmul.mubr.msk.f32.vlgmr.msra.gmra.mxu1 %vm149_vm0, %v216_v28  ;;  %v139_v32 = vmul.f32 %v1066_v19, %v133_v30  ;;  %v1086_v28 = vld [vmem:[%s1607_s5 + $0x3] ss:$0 sm:$0xff] }
 0x177   :  { %1167 = vmatprep.mubr.msk.f32.mxu1 %vm149_vm0, %v217_v25  ;;  %v134_v33 = vmul.f32 %v1253_v31, %v1504_v39  ;;  %v218_v34 = vadd.f32 %v1069_v12, %v210_v27  ;;  %v854_v25 = vld [vmem:[#allocation8 + $0x50] sm:$0xff] }
 0x178   :  { %v1534_v35 = vadd.f32 %v1067_v20, %v139_v32 }
 0x179   :  { %v140_v36 = vmul.f32 %v1066_v19, %v134_v33  ;;  %v853_v19 = vld [vmem:[#allocation8 + $0x48] sm:$0xff] }
 0x17a   :  { %1149 = vmatprep.mubr.msk.f32.mxu0 %vm107_vm1, %v1534_v35  ;;  %1168 = vmatmul.mubr.msk.f32.gmra.mxu1 %vm149_vm0, %v218_v34  ;;  %v956_v34 = vld [vmem:[#allocation8 + $0x78] sm:$0xff] }
 0x17b   :  { %v1539_v29 = vadd.f32 %v1067_v20, %v140_v36  ;;  %1188 = vmatprep.mubr.msk.f32.mxu1 %vm1402_vm2, %v1401_v37  ;;  %v955_v36 = vld [vmem:[#allocation8 + $0x70] sm:$0xff] }
 0x17d   :  { %1150 = vmatmul.mubr.msk.f32.vlgmr.msra.gmra.mxu0 %vm107_vm1, %v1539_v29 }
 0x17e   :  { %1174 = vmatprep.mubr.msk.f32.mxu0 %vm1402_vm2, %v1401_v37 }
 0x236   :  { %v1166_v39 = vpop.f32.mrf.mxu1 }
 0x237   :  { %v406_v40 = vadd.f32 %v1166_v39, %v1073_v38 }
 0x238   :  { %v400_v41 = vpop.f32.mrf.mxu1 }
 0x239   :  { %1171 = vmatpush3.xpose.msk.msra.mxu0 %vm107_vm1, %v406_v40  ;;  %v401_v43 = vadd.f32 %v1073_v38, %v400_v41 }
 0x23a   :  { %v1169_v42 = vpop.f32.mrf.mxu1  ;;  %1172 = vmatprep.subr.mxu0 %v1401_v37 }
 0x23b   :  { %v416_v44 = vadd.f32 %v1169_v42, %v1073_v38 }
 0x23c   :  { %v410_v45 = vpop.f32.mrf.mxu1 }
 0x23d   :  { %1173 = vmatpush3.xpose.msk.msra.mxu0 %vm107_vm1, %v401_v43  ;;  %1185 = vmatpush3.xpose.msk.msra.mxu1 %vm107_vm1, %v416_v44  ;;  %v1151_v46 = vpop.f32.mrf.mxu0  ;;  %v411_v47 = vadd.f32 %v1073_v38, %v410_v45  ;;  %v953_v38 = vld [vmem:[#allocation8 + $0x60] sm:$0xff] }
 0x23e   :  { %1186 = vmatprep.subr.mxu1 %v1401_v37  ;;  %1177 = vmatprep.subr.mxu0 %v1401_v37  ;;  %v306_v51 = vadd.f32 %v1151_v46, %v1070_v48 }
 0x23f   :  { %v300_v49 = vpop.f32.mrf.mxu0 }
 0x240   :  { %v301_v50 = vadd.f32 %v1070_v48, %v300_v49 }
 0x241   :  { %1187 = vmatpush3.xpose.msk.msra.mxu1 %vm107_vm1, %v411_v47 }
 0x242   :  { %1175 = vmatmul.mubr.msk.f32.vlgmr.msra.gmra.mxu0 %vm107_vm1, %v301_v50  ;;  %1198 = vmatprep.subr.mxu1 %v762_v4 }
 0x243   :  { %1181 = vmatprep.mubr.msk.f32.mxu0 %vm1402_vm2, %v1401_v37 }
 0x244   :  { %1189 = vmatmul.mubr.msk.f32.vlgmr.msra.gmra.mxu1 %vm107_vm1, %v306_v51 }
 0x245   :  { %1199 = vmatpush3.msra.mxu1 %v762_v4 }
 0x246   :  { %1200 = vmatprep.subr.mxu1 %v761_v5 }
 0x247   :  { %1201 = vmatpush3.msra.mxu1 %v761_v5 }
 0x248   :  { %1202 = vmatprep.subr.mxu1 %v760_v16 }
 0x249   :  { %1203 = vmatpush3.msra.mxu1 %v760_v16 }
 0x24a   :  { %1204 = vmatprep.subr.mxu1 %v759_v17 }
 0x24b   :  { %1205 = vmatpush3.msra.mxu1 %v759_v17 }
 0x24c   :  { %1220 = vmatprep.subr.mxu1 %v956_v34 }
 0x302   :  { %v494_v52 = vpop.f32.mrf.mxu0 }
 0x303   :  { %v499_v53 = vsel %vm498_vm3, %v494_v52, -inf }
 0x304   :  { %v664_v54 = vpop.f32.mrf.mxu1  ;;  %500 = vmax.xlane.f32.xlu0 %v499_v53  ;;  %v1176_v55 = vpop.f32.mrf.mxu0 }
 0x305   :  { %v668_v56 = vsel %vm498_vm3, %v664_v54, -inf }
 0x306   :  { %669 = vmax.xlane.f32.xlu1 %v668_v56  ;;  %v1190_v57 = vpop.f32.mrf.mxu1 }
 0x317   :  { %510 = vrot.lane.b32.xlu1 %v401_v43, %s1403_s17 }
 0x31b   :  { %681 = vrot.lane.b32.xlu1 %v416_v44, %s1403_s17 }
 0x38d   :  { %v501_v58 = vpop.xlane.xlu0 %500 }
 0x38e   :  { %v502_v59 = vsub.f32 %v494_v52, %v501_v58  ;;  %v1092_v52 = vld [vmem:[%s1607_s5 + $0x5] ss:$0 sm:$0xff] }
 0x38f   :  { %v670_v60 = vpop.xlane.xlu1 %669 }
 0x390   :  { %v503_v61 = vmul.f32 1.442695, %v502_v59  ;;  %v671_v62 = vsub.f32 %v664_v54, %v670_v60 }
 0x392   :  { %1254 = vpow2.f32 %v503_v61  ;;  %v672_v63 = vmul.f32 1.442695, %v671_v62 }
 0x393   :  { %v511_v6 = vpop.permute.xlu1 %510 }
 0x394   :  { %1256 = vpow2.f32 %v672_v63 }
 0x397   :  { %v682_v7 = vpop.permute.xlu1 %681 }
 0x39f   :  { %v1255_v0 = vpop.eup %1254 }
 0x3a0   :  { %v505_v1 = vsel %vm498_vm3, %v1255_v0, 0.0 }
 0x3a1   :  { %v1257_v2 = vpop.eup %1256  ;;  %506 = vadd.xlane.f32.xlu0 %v505_v1 }
 0x3a2   :  { %v674_v3 = vsel %vm498_vm3, %v1257_v2, 0.0 }
 0x3a3   :  { %675 = vadd.xlane.f32.xlu1 %v674_v3 }
 0x3b4   :  { %679 = vrot.lane.b32.xlu1 %v411_v47, %s1403_s17 }
 0x3b7   :  { %512 = vrot.lane.b32.xlu0 %v406_v40, %s1403_s17 }
 0x42a   :  { %v507_v8 = vpop.xlane.xlu0 %506 }
 0x42b   :  { %1258 = vrcp.f32 %v507_v8 }
 0x42c   :  { %v676_v9 = vpop.xlane.xlu1 %675 }
 0x42d   :  { %1260 = vrcp.f32 %v676_v9 }
 0x42e   :  { %v513_v10 = vpop.permute.xlu0 %512 }
 0x42f   :  { %1178 = vmatpush3.msra.mxu0 %v513_v10 }
 0x430   :  { %1179 = vmatprep.subr.mxu0 %v1401_v37  ;;  %v680_v14 = vpop.permute.xlu1 %679 }
 0x431   :  { %1180 = vmatpush3.msra.mxu0 %v511_v6 }
 0x432   :  { %1191 = vmatprep.subr.mxu0 %v1401_v37 }
 0x438   :  { %v1259_v11 = vpop.eup %1258 }
 0x439   :  { %v509_v12 = vmul.f32 %v1259_v11, %v1255_v0 }
 0x43a   :  { %v1261_v13 = vpop.eup %1260 }
 0x43b   :  { %1182 = vmatmul.mubr.msk.f32.vlgmr.msra.gmra.mxu0 %vm498_vm3, %v509_v12  ;;  %v678_v15 = vmul.f32 %v1261_v13, %v1257_v2 }
 0x43c   :  { %1192 = vmatpush3.msra.mxu0 %v682_v7  ;;  %1195 = vmatprep.mubr.msk.f32.mxu0 %vm1402_vm2, %v1401_v37 }
 0x43d   :  { %1193 = vmatprep.subr.mxu0 %v1401_v37  ;;  %v954_v37 = vld [vmem:[#allocation8 + $0x68] sm:$0xff] }
 0x43e   :  { %1194 = vmatpush3.msra.mxu0 %v680_v14 }
 0x43f   :  { %1196 = vmatmul.mubr.msk.f32.vlgmr.msra.gmra.mxu0 %vm498_vm3, %v678_v15  ;;  %1209 = vmatprep.subr.mxu0 %v855_v24 }
 0x440   :  { %1210 = vmatpush3.msra.mxu0 %v855_v24 }
 0x441   :  { %1211 = vmatprep.subr.mxu0 %v854_v25 }
 0x442   :  { %1212 = vmatpush3.msra.mxu0 %v854_v25 }
 0x443   :  { %1213 = vmatprep.subr.mxu0 %v853_v19 }
 0x444   :  { %1214 = vmatpush3.msra.mxu0 %v853_v19 }
 0x445   :  { %1215 = vmatprep.subr.mxu0 %v852_v26 }
 0x446   :  { %1216 = vmatpush3.msra.mxu0 %v852_v26 }
 0x4fb   :  { %v585_v18 = vpop.f32.mrf.mxu0 }
 0x4fc   :  { %1206 = vmatprep.mubr.msk.f32.mxu1 %vm107_vm1, %v585_v18 }
 0x4fd   :  { %v1183_v21 = vpop.f32.mrf.mxu0 }
 0x4ff   :  { %v754_v22 = vpop.f32.mrf.mxu0 }
 0x500   :  { %1207 = vmatmul.mubr.msk.f32.vlgmr.msra.gmra.mxu1 %vm107_vm1, %v754_v22 }
 0x501   :  { %v1197_v23 = vpop.f32.mrf.mxu0  ;;  %1221 = vmatpush3.msra.mxu1 %v956_v34 }
 0x502   :  { %1222 = vmatprep.subr.mxu1 %v955_v36 }
 0x503   :  { %1223 = vmatpush3.msra.mxu1 %v955_v36 }
 0x504   :  { %1224 = vmatprep.subr.mxu1 %v954_v37 }
 0x505   :  { %1225 = vmatpush3.msra.mxu1 %v954_v37 }
 0x506   :  { %1226 = vmatprep.subr.mxu1 %v953_v38 }
 0x507   :  { %1227 = vmatpush3.msra.mxu1 %v953_v38 }
 0x5c0   :  { %v1208_v30 = vpop.f32.mrf.mxu1 }
 0x5c1   :  { %v846_v20 = vadd.f32 %v1208_v30, %v1086_v28 }
 0x5c2   :  { %v840_v27 = vpop.f32.mrf.mxu1 }
 0x5c3   :  { %v841_v31 = vadd.f32 %v1086_v28, %v840_v27  ;;  %v850_v33 = vadd.f32 %v846_v20, %v1539_v29 }
 0x5c5   :  { %v849_v32 = vadd.f32 %v841_v31, %v1534_v35  ;;  %v1089_v35 = vld [vmem:[%s1607_s5 + $0x4] ss:$0 sm:$0xff] }
 0x5c7   :  { %1217 = vmatprep.mubr.msk.f32.mxu0 %vm107_vm1, %v849_v32 }
 0x5c8   :  { %1218 = vmatmul.mubr.msk.f32.vlgmr.msra.gmra.mxu0 %vm107_vm1, %v850_v33 }
 0x688   :  { %v1219_v29 = vpop.f32.mrf.mxu0 }
 0x689   :  { %v939_v39 = vadd.f32 %v1219_v29, %v1089_v35 }
 0x68a   :  { %v933_v40 = vpop.f32.mrf.mxu0 }
 0x68b   :  { %v945_v41 = vmul.f32 0.70710677, %v939_v39  ;;  %v934_v42 = vadd.f32 %v1089_v35, %v933_v40  ;;  %v943_v49 = vmul.f32 0.5, %v939_v39 }
 0x68d   :  { %1262 = verf.f32 %v945_v41  ;;  %v944_v43 = vmul.f32 0.70710677, %v934_v42  ;;  %v942_v47 = vmul.f32 0.5, %v934_v42 }
 0x68f   :  { %1264 = verf.f32 %v944_v43 }
 0x69a   :  { %v1263_v44 = vpop.eup %1262 }
 0x69b   :  { %v949_v46 = vadd.f32 1.0, %v1263_v44 }
 0x69c   :  { %v1265_v45 = vpop.eup %1264 }
 0x69d   :  { %v948_v48 = vadd.f32 1.0, %v1265_v45  ;;  %v951_v51 = vmul.f32 %v949_v46, %v943_v49 }
 0x69f   :  { %v950_v50 = vmul.f32 %v948_v48, %v942_v47 }
 0x6a1   :  { %1228 = vmatprep.mubr.msk.f32.mxu1 %vm107_vm1, %v950_v50 }
 0x6a2   :  { %1229 = vmatmul.mubr.msk.f32.vlgmr.msra.gmra.mxu1 %vm107_vm1, %v951_v51 }
 0x762   :  { %v1230_v53 = vpop.f32.mrf.mxu1 }
 0x763   :  { %v1040_v54 = vadd.f32 %v1230_v53, %v1092_v52 }
 0x764   :  { %v1034_v55 = vpop.f32.mrf.mxu1 }
 0x765   :  { %v1044_v56 = vadd.f32 %v1040_v54, %v850_v33  ;;  %v1035_v57 = vadd.f32 %v1092_v52, %v1034_v55 }
 0x767   :  { %1046 = vst.msk [vmem:[#allocation11 + $0x8] sm:$0xff] %vm107_vm1, %v1044_v56  ;;  %v1043_v58 = vadd.f32 %v1035_v57, %v849_v32 }
 0x769   :  { %1045 = vst.msk [vmem:[#allocation11] sm:$0xff] %vm107_vm1, %v1043_v58 }
 0x76a   :  { %1377 = shalt.err (!%p1374_p1)
}
 0x76b   :  { %1058 = dma.vmem_to_hbm [thread:$0]  %s1053_s23, 256, %s1610_s8, [#allocation4], %s1396_s10, %s1396_s10, %s1397_s11  }
 0x76c   :  { %1392 = dma.done.wait [#allocation4], 256  }
 0x76d   :  { %1393 = vsyncadd [#allocation4], 4294967040 }
 0x76e   :  { %1062 = vsyncpa [#allocation3], 1 }
 0x76f   :  { %1063 = vsyncpa [#allocation6], 1 }
 0x770   :  { %1064 = vsyncpa [#allocation9], 1 }
 0x771   :  { %1065 = vsyncpa [#allocation4], 1 }

</bundles_post_ra>
